<compile_context>
chip_gen: v7x
topology: tpu7x:2x2x1
jax: 0.10.0
libtpu: 0.0.40
codegen_flags: <defaults>
</compile_context>

<pallas_src>
import functools

import jax
import jax.numpy as jnp
from jax.experimental import pallas as pl
from jax.experimental.pallas import tpu as pltpu


def _round_up(x, m):
    return (x + m - 1) // m * m


def _cnn_att_pool_kernel(TB, L, FK, FK_pad,
                         xcol_ref, wcol_ref, bconv_ref,
                         attW_ref, attb_ref, attv_ref,
                         xatt_ref, m_ref):
    """One batch tile: conv bank + relu + max-pool + attention pooling."""
    MKV = xcol_ref.shape[-1]                                     # MAXK*V (lane-dense)

    # --- conv bank (all filter widths fused) as one im2col matmul + bias + relu ---
    xcol = xcol_ref[...].reshape(TB * L, MKV)                    # (TB*L, MAXK*V)
    hflat = jnp.dot(xcol, wcol_ref[...],
                    preferred_element_type=jnp.float32)          # (TB*L, FK_pad)
    hflat = jnp.maximum(hflat + bconv_ref[...], 0.0)             # padded lanes stay 0
    h = hflat.reshape(TB, L, FK_pad)                             # PyTorch x, transposed

    # --- max-pool over the full sequence axis ---
    m_ref[...] = jnp.max(h, axis=1).astype(m_ref.dtype)          # (TB, FK_pad)

    # --- attention: u = tanh(attW @ h + attb); one batched MXU einsum ---
    attW_b = jnp.broadcast_to(attW_ref[...][None, :, :], (TB, L, L))
    u = jnp.einsum("bij,bjc->bic", attW_b, h,
                   preferred_element_type=jnp.float32)           # (TB, L, FK_pad)
    u = jnp.tanh(u + attb_ref[...][None, :, :])

    # scores over channels, masked softmax (padded lanes -> 0 probability)
    s = jnp.sum(u * attv_ref[...][None, :, :], axis=1)           # (TB, FK_pad)
    lane = jax.lax.broadcasted_iota(jnp.int32, (1, FK_pad), 1)
    s = jnp.where(lane < FK, s, jnp.float32(-1e30))
    s = s - jnp.max(s, axis=1, keepdims=True)
    e = jnp.exp(s)
    p = e * pl.reciprocal(jnp.sum(e, axis=1, keepdims=True), approx=True)

    # --- attention-weighted pooling over channels (the bmm in PyTorch) ---
    xatt_ref[...] = jnp.sum(h * p[:, None, :], axis=2).astype(xatt_ref.dtype)


def cnn_att_pool_forward(x_ids, params, cfg, *, batch_tile=128,
                         matmul_dtype=jnp.float32):
    L = cfg["remain_l"]
    V = cfg["vec_len"]
    K = cfg["kernel_num"]
    ks = cfg["kernel_sizes"]
    F = len(ks)
    MAXK = max(ks)
    FK = F * K
    FK_pad = _round_up(FK, 128)
    B = x_ids.shape[0]

    # Batch tile: sublane-aligned, capped by the (padded) batch.  A tile of TB
    # costs ~TB*L*MAXK*V*itemsize double-buffered in VMEM -> tiny here; raise
    # batch_tile for production batches, keeping it under the VMEM budget below.
    TB = min(_round_up(B, 8), _round_up(batch_tile, 8))
    B_pad = _round_up(B, TB)
    n_tiles = B_pad // TB

    # --- glue: embedding lookup + right zero-pad + lane-dense im2col pack ---
    emb = jnp.take(params["W_emb"], x_ids, axis=0)               # (B, L, V)
    emb_pad = jnp.pad(emb, ((0, B_pad - B), (0, MAXK - 1), (0, 0)))
    # xcol[b, t, j*V + v] = emb_pad[b, t + j, v]
    xcol = jnp.concatenate([emb_pad[:, j:j + L, :] for j in range(MAXK)],
                           axis=2)                               # (B_pad, L, MAXK*V)
    xcol = xcol.astype(matmul_dtype)

    # --- glue: pack conv weights im2col-style, padded to FK_pad output lanes ---
    wcol = jnp.zeros((FK_pad, MAXK * V), jnp.float32)
    for i, k in enumerate(ks):
        wcol = wcol.at[i * K:(i + 1) * K, :k * V].set(
            params["conv_w"][i].reshape(K, k * V))
    wcolT = wcol.T.astype(matmul_dtype)                          # (MAXK*V, FK_pad)
    bconv = jnp.zeros((1, FK_pad), jnp.float32).at[0, :FK].set(
        jnp.concatenate(params["conv_b"], axis=0))
    attW = params["att_w"]                                       # (L, L)
    attb = params["att_b"].reshape(L, 1)
    attv = params["att_v"]                                       # (L, 1)

    kernel = functools.partial(_cnn_att_pool_kernel, TB, L, FK, FK_pad)

    itemsize = jnp.dtype(matmul_dtype).itemsize
    flops = int(2 * B_pad * L * (MAXK * V) * FK_pad            # conv matmul
                + 2 * B_pad * L * L * FK_pad                   # attention matmul
                + 8 * B_pad * L * FK_pad)                      # elementwise/reduces
    transcendentals = int(B_pad * L * FK_pad + B_pad * FK_pad)  # tanh + exp
    bytes_accessed = int(xcol.size * itemsize + wcolT.size * itemsize
                         + (bconv.size + attW.size + attb.size + attv.size) * 4
                         + (B_pad * L + B_pad * FK_pad) * 4)

    xatt, m = pl.pallas_call(
        kernel,
        out_shape=(jax.ShapeDtypeStruct((B_pad, L), jnp.float32),
                   jax.ShapeDtypeStruct((B_pad, FK_pad), jnp.float32)),
        grid=(n_tiles,),
        in_specs=[
            pl.BlockSpec((TB, L, MAXK * V), lambda i: (i, 0, 0)),   # activations
            pl.BlockSpec((MAXK * V, FK_pad), lambda i: (0, 0)),     # conv weights
            pl.BlockSpec((1, FK_pad), lambda i: (0, 0)),            # conv bias
            pl.BlockSpec((L, L), lambda i: (0, 0)),                 # attention W
            pl.BlockSpec((L, 1), lambda i: (0, 0)),                 # attention b
            pl.BlockSpec((L, 1), lambda i: (0, 0)),                 # attention v
        ],
        out_specs=(pl.BlockSpec((TB, L), lambda i: (i, 0)),
                   pl.BlockSpec((TB, FK_pad), lambda i: (i, 0))),
        compiler_params=pltpu.CompilerParams(
            dimension_semantics=("parallel",),
            vmem_limit_bytes=32 * 1024 * 1024,   # explicit; headroom on v7x 64MiB
        ),
        cost_estimate=pl.CostEstimate(flops=flops,
                                      transcendentals=transcendentals,
                                      bytes_accessed=bytes_accessed),
    )(xcol, wcolT, bconv, attW, attb, attv)

    # --- glue: strip padding, concat features, final FC (dropout = identity) ---
    feat = jnp.concatenate([xatt[:B], m[:B, :FK]], axis=1)       # (B, L + FK)
    return feat @ params["fc_w"].T + params["fc_b"]


def reference_forward(x_ids, params, cfg):
    """Plain-JAX emulation of the PyTorch forward (eval mode)."""
    L = cfg["remain_l"]
    K = cfg["kernel_num"]
    ks = cfg["kernel_sizes"]
    emb = jnp.take(params["W_emb"], x_ids, axis=0)               # (B, L, V)
    Xs, Ms = [], []
    for i, k in enumerate(ks):
        xp = jnp.pad(emb, ((0, 0), (0, k - 1), (0, 0)))
        w = params["conv_w"][i]                                  # (K, k, V)
        b = params["conv_b"][i]                                  # (K,)
        h = jnp.stack(
            [jnp.einsum("bjd,cjd->bc", xp[:, t:t + k, :], w) for t in range(L)],
            axis=2) + b[None, :, None]                           # (B, K, L)
        h = jnp.maximum(h, 0.0)
        Xs.append(h)
        Ms.append(jnp.max(h, axis=2))
    x = jnp.concatenate(Xs, axis=1)                              # (B, FK, L)
    m = jnp.concatenate(Ms, axis=1)                              # (B, FK)
    u = jnp.tanh(x @ params["att_w"].T + params["att_b"])        # (B, FK, L)
    s = (u @ params["att_v"])[:, :, 0]                           # (B, FK)
    p = jax.nn.softmax(s, axis=1)
    xa = jnp.einsum("bc,bcl->bl", p, x)                          # (B, L)
    feat = jnp.concatenate([xa, m], axis=1)
    return feat @ params["fc_w"].T + params["fc_b"]


if __name__ == "__main__":
    cfg = dict(vec_len=32, kernel_sizes=[2, 3, 4], kernel_num=4,
               remain_l=8, dropout=0.5)
    vocab = 20
    B = 2
    L, V, K = cfg["remain_l"], cfg["vec_len"], cfg["kernel_num"]
    ks = cfg["kernel_sizes"]
    FK = len(ks) * K

    key = jax.random.PRNGKey(0)
    keys = jax.random.split(key, 16)
    params = {
        "W_emb": 0.1 * jax.random.normal(keys[0], (vocab, V), jnp.float32),
        "conv_w": [0.05 * jax.random.normal(keys[1 + i], (K, k, V), jnp.float32)
                   for i, k in enumerate(ks)],
        "conv_b": [0.05 * jax.random.normal(keys[5 + i], (K,), jnp.float32)
                   for i in range(len(ks))],
        "att_w": 0.1 * jax.random.normal(keys[9], (L, L), jnp.float32),
        "att_b": 0.1 * jax.random.normal(keys[10], (L,), jnp.float32),
        "att_v": jax.random.uniform(keys[11], (L, 1), jnp.float32),
        "fc_w": 0.1 * jax.random.normal(keys[12], (2, L + FK), jnp.float32),
        "fc_b": 0.1 * jax.random.normal(keys[13], (2,), jnp.float32),
    }
    x_ids = jax.random.randint(keys[14], (B, L), 0, vocab, dtype=jnp.int32)

    fwd_f32 = jax.jit(lambda ids, p: cnn_att_pool_forward(ids, p, cfg))
    fwd_bf16 = jax.jit(lambda ids, p: cnn_att_pool_forward(
        ids, p, cfg, matmul_dtype=jnp.bfloat16))

    ref = jax.block_until_ready(reference_forward(x_ids, params, cfg))

    out = jax.block_until_ready(fwd_f32(x_ids, params))
    assert out.shape == (B, 2), out.shape
    err = float(jnp.max(jnp.abs(out - ref)))
    # tolerance accounts for the EUP approximate-reciprocal softmax normalization
    assert err < 2e-3, f"f32 mismatch vs reference: {err}"

    # bf16 MXU operands (v6e/v7x path): looser tolerance.
    out_bf16 = jax.block_until_ready(fwd_bf16(x_ids, params))
    err_bf16 = float(jnp.max(jnp.abs(out_bf16 - ref)))
    assert err_bf16 < 5e-2, f"bf16 mismatch vs reference: {err_bf16}"

    print("KERNEL_OK")
</pallas_src>

<mosaic_0001>
module attributes {stable_mosaic.version = 11 : i64} {
  func.func @_cnn_att_pool_kernel(%arg0: i32, %arg1: memref<8x8x128xf32, #tpu.memory_space<vmem>>, %arg2: memref<128x128xf32, #tpu.memory_space<vmem>>, %arg3: memref<1x128xf32, #tpu.memory_space<vmem>>, %arg4: memref<8x8xf32, #tpu.memory_space<vmem>>, %arg5: memref<8x1xf32, #tpu.memory_space<vmem>>, %arg6: memref<8x1xf32, #tpu.memory_space<vmem>>, %arg7: memref<8x8xf32, #tpu.memory_space<vmem>>, %arg8: memref<8x128xf32, #tpu.memory_space<vmem>>) attributes {dimension_semantics = [#tpu.dimension_semantics<parallel>], iteration_bounds = array<i64: 1>, scalar_prefetch = 0 : i64, scratch_operands = 0 : i64, tpu.core_type = #tpu.core_type<tc>, window_params = [{transform_indices = @transform_0, window_bounds = array<i64: 8, 8, 128>}, {pipeline_mode = #tpu.pipeline_mode<synchronous>, transform_indices = @transform_1, window_bounds = array<i64: 128, 128>}, {pipeline_mode = #tpu.pipeline_mode<synchronous>, transform_indices = @transform_2, window_bounds = array<i64: 1, 128>}, {pipeline_mode = #tpu.pipeline_mode<synchronous>, transform_indices = @transform_3, window_bounds = array<i64: 8, 8>}, {pipeline_mode = #tpu.pipeline_mode<synchronous>, transform_indices = @transform_4, window_bounds = array<i64: 8, 1>}, {pipeline_mode = #tpu.pipeline_mode<synchronous>, transform_indices = @transform_5, window_bounds = array<i64: 8, 1>}, {transform_indices = @transform_6, window_bounds = array<i64: 8, 8>}, {transform_indices = @transform_7, window_bounds = array<i64: 8, 128>}]} {
    %c0 = arith.constant 0 : index
    %c0_0 = arith.constant 0 : index
    %c0_1 = arith.constant 0 : index
    %0 = vector.load %arg1[%c0, %c0_0, %c0_1] : memref<8x8x128xf32, #tpu.memory_space<vmem>>, vector<8x8x128xf32>
    %1 = vector.shape_cast %0 : vector<8x8x128xf32> to vector<64x128xf32>
    %c0_2 = arith.constant 0 : index
    %c0_3 = arith.constant 0 : index
    %2 = vector.load %arg2[%c0_2, %c0_3] : memref<128x128xf32, #tpu.memory_space<vmem>>, vector<128x128xf32>
    %cst = arith.constant dense<0.000000e+00> : vector<64x128xf32>
    %3 = tpu.matmul %1, %2, %cst {dimension_numbers = #tpu.dot_dimension_numbers<[1], [0], [0], [1], [0, 0, 1, 1], [], []>} : vector<64x128xf32>, vector<128x128xf32>, vector<64x128xf32> -> vector<64x128xf32>
    %c0_4 = arith.constant 0 : index
    %c0_5 = arith.constant 0 : index
    %4 = vector.load %arg3[%c0_4, %c0_5] : memref<1x128xf32, #tpu.memory_space<vmem>>, vector<1x128xf32>
    %5 = vector.broadcast %4 : vector<1x128xf32> to vector<64x128xf32>
    %6 = arith.addf %3, %5 : vector<64x128xf32>
    %cst_6 = arith.constant 0.000000e+00 : f32
    %7 = vector.broadcast %cst_6 : f32 to vector<64x128xf32>
    %8 = arith.maximumf %6, %7 : vector<64x128xf32>
    %9 = vector.shape_cast %8 : vector<64x128xf32> to vector<8x8x128xf32>
    %cst_7 = arith.constant dense<0xFF800000> : vector<8x128xf32>
    %10 = vector.multi_reduction <maximumf>, %9, %cst_7 [1] : vector<8x8x128xf32> to vector<8x128xf32>
    %c0_8 = arith.constant 0 : index
    %c0_9 = arith.constant 0 : index
    %11 = vector.load %arg8[%c0_8, %c0_9] : memref<8x128xf32, #tpu.memory_space<vmem>>, vector<8x128xf32>
    tpu.vector_store %arg8[%c0_8, %c0_9], %10 {strides = array<i32>} : memref<8x128xf32, #tpu.memory_space<vmem>>, vector<8x128xf32>,
    %c0_10 = arith.constant 0 : index
    %c0_11 = arith.constant 0 : index
    %12 = vector.load %arg4[%c0_10, %c0_11] : memref<8x8xf32, #tpu.memory_space<vmem>>, vector<8x8xf32>
    %13 = vector.shape_cast %12 : vector<8x8xf32> to vector<1x8x8xf32>
    %14 = vector.shape_cast %13 : vector<1x8x8xf32> to vector<1x8x8xf32>
    %15 = vector.broadcast %14 : vector<1x8x8xf32> to vector<8x8x8xf32>
    "tpu.trace_start"() <{level = 10 : i32, message = "bij,bjc->bic"}> : () -> ()
    %cst_12 = arith.constant dense<0.000000e+00> : vector<8x8x128xf32>
    %16 = tpu.matmul %15, %9, %cst_12 {dimension_numbers = #tpu.dot_dimension_numbers<[2], [1], [1], [2], [0, 0, 0, 1, 1, 2], [0], [0]>} : vector<8x8x8xf32>, vector<8x8x128xf32>, vector<8x8x128xf32> -> vector<8x8x128xf32>
    "tpu.trace_stop"() : () -> ()
    %c0_13 = arith.constant 0 : index
    %c0_14 = arith.constant 0 : index
    %17 = vector.load %arg5[%c0_13, %c0_14] : memref<8x1xf32, #tpu.memory_space<vmem>>, vector<8x1xf32>
    %18 = vector.shape_cast %17 : vector<8x1xf32> to vector<1x8x1xf32>
    %19 = vector.broadcast %18 : vector<1x8x1xf32> to vector<8x8x128xf32>
    %20 = arith.addf %16, %19 : vector<8x8x128xf32>
    %21 = math.tanh %20 : vector<8x8x128xf32>
    %c0_15 = arith.constant 0 : index
    %c0_16 = arith.constant 0 : index
    %22 = vector.load %arg6[%c0_15, %c0_16] : memref<8x1xf32, #tpu.memory_space<vmem>>, vector<8x1xf32>
    %23 = vector.shape_cast %22 : vector<8x1xf32> to vector<1x8x1xf32>
    %24 = vector.broadcast %23 : vector<1x8x1xf32> to vector<8x8x128xf32>
    %25 = arith.mulf %21, %24 : vector<8x8x128xf32>
    %cst_17 = arith.constant dense<0.000000e+00> : vector<8x128xf32>
    %26 = vector.multi_reduction <add>, %25, %cst_17 [1] : vector<8x8x128xf32> to vector<8x128xf32>
    %27 = tpu.iota {dimensions = array<i32: 1>} : vector<1x128xi32>
    %c12_i32 = arith.constant 12 : i32
    %28 = vector.broadcast %c12_i32 : i32 to vector<1x128xi32>
    %29 = arith.cmpi slt, %27, %28 : vector<1x128xi32>
    %cst_18 = arith.constant -1.000000e+30 : f32
    %30 = vector.shape_cast %29 : vector<1x128xi1> to vector<1x128xi1>
    %31 = vector.broadcast %30 : vector<1x128xi1> to vector<8x128xi1>
    %32 = vector.broadcast %cst_18 : f32 to vector<8x128xf32>
    %33 = arith.select %31, %26, %32 : vector<8x128xi1>, vector<8x128xf32>
    %cst_19 = arith.constant dense<0xFF800000> : vector<8xf32>
    %34 = vector.multi_reduction <maximumf>, %33, %cst_19 [1] : vector<8x128xf32> to vector<8xf32>
    %35 = vector.shape_cast %34 : vector<8xf32> to vector<8x1xf32>
    %36 = vector.broadcast %35 : vector<8x1xf32> to vector<8x128xf32>
    %37 = arith.subf %33, %36 : vector<8x128xf32>
    %38 = math.exp %37 : vector<8x128xf32>
    %cst_20 = arith.constant dense<0.000000e+00> : vector<8xf32>
    %39 = vector.multi_reduction <add>, %38, %cst_20 [1] : vector<8x128xf32> to vector<8xf32>
    %40 = vector.shape_cast %39 : vector<8xf32> to vector<8x1xf32>
    %41 = tpu.reciprocal %40 {approx = true} : vector<8x1xf32> -> vector<8x1xf32>
    %42 = vector.broadcast %41 : vector<8x1xf32> to vector<8x128xf32>
    %43 = arith.mulf %38, %42 : vector<8x128xf32>
    %44 = vector.shape_cast %43 : vector<8x128xf32> to vector<8x1x128xf32>
    %45 = vector.broadcast %44 : vector<8x1x128xf32> to vector<8x8x128xf32>
    %46 = arith.mulf %9, %45 : vector<8x8x128xf32>
    %cst_21 = arith.constant dense<0.000000e+00> : vector<8x8xf32>
    %47 = vector.multi_reduction <add>, %46, %cst_21 [2] : vector<8x8x128xf32> to vector<8x8xf32>
    %c0_22 = arith.constant 0 : index
    %c0_23 = arith.constant 0 : index
    %48 = vector.load %arg7[%c0_22, %c0_23] : memref<8x8xf32, #tpu.memory_space<vmem>>, vector<8x8xf32>
    tpu.vector_store %arg7[%c0_22, %c0_23], %47 {strides = array<i32>} : memref<8x8xf32, #tpu.memory_space<vmem>>, vector<8x8xf32>,
    return
  }
  func.func @transform_0(%arg0: i32) -> (i32, i32, i32) {
    %c0_i32 = arith.constant 0 : i32
    %c0_i32_0 = arith.constant 0 : i32
    %c0_i32_1 = arith.constant 0 : i32
    return %arg0, %c0_i32, %c0_i32_0 : i32, i32, i32
  }
  func.func @transform_1(%arg0: i32) -> (i32, i32) {
    %c0_i32 = arith.constant 0 : i32
    %c0_i32_0 = arith.constant 0 : i32
    %c0_i32_1 = arith.constant 0 : i32
    return %c0_i32, %c0_i32_0 : i32, i32
  }
  func.func @transform_2(%arg0: i32) -> (i32, i32) {
    %c0_i32 = arith.constant 0 : i32
    %c0_i32_0 = arith.constant 0 : i32
    %c0_i32_1 = arith.constant 0 : i32
    return %c0_i32, %c0_i32_0 : i32, i32
  }
  func.func @transform_3(%arg0: i32) -> (i32, i32) {
    %c0_i32 = arith.constant 0 : i32
    %c0_i32_0 = arith.constant 0 : i32
    %c0_i32_1 = arith.constant 0 : i32
    return %c0_i32, %c0_i32_0 : i32, i32
  }
  func.func @transform_4(%arg0: i32) -> (i32, i32) {
    %c0_i32 = arith.constant 0 : i32
    %c0_i32_0 = arith.constant 0 : i32
    %c0_i32_1 = arith.constant 0 : i32
    return %c0_i32, %c0_i32_0 : i32, i32
  }
  func.func @transform_5(%arg0: i32) -> (i32, i32) {
    %c0_i32 = arith.constant 0 : i32
    %c0_i32_0 = arith.constant 0 : i32
    %c0_i32_1 = arith.constant 0 : i32
    return %c0_i32, %c0_i32_0 : i32, i32
  }
  func.func @transform_6(%arg0: i32) -> (i32, i32) {
    %c0_i32 = arith.constant 0 : i32
    %c0_i32_0 = arith.constant 0 : i32
    return %arg0, %c0_i32 : i32, i32
  }
  func.func @transform_7(%arg0: i32) -> (i32, i32) {
    %c0_i32 = arith.constant 0 : i32
    %c0_i32_0 = arith.constant 0 : i32
    return %arg0, %c0_i32 : i32, i32
  }
}

</mosaic_0001>

<bundles_post_ra>
// kernel: _lambda_.1
= control target key start
LH: loop header
LB: loop body
LE: loop exit
PB: predicated region body
PF: predicated region fallthrough
CT: control target
= control target key end

     0   :  { %v1274_v32 = vmov 0.0   ;;  %vm1275_vm0 = vmmov 0   ;;  %v1276_v33 = vmov 0   ;;  %vm248_vm1 = vcmask 64512   ;;  %s1549_s1 = inlined_call_operand.vmem [shape: f32[128,128], index: 1, kind: input, shape index: {}]   ;;  %s1550_s0 = inlined_call_operand.vmem [shape: f32[8,8,128], index: 0, kind: input, shape index: {}]   ;;  %s1551_s4 = inlined_call_operand.vmem [shape: f32[8,1], index: 4, kind: input, shape index: {}]   ;;  %s1552_s5 = inlined_call_operand.vmem [shape: f32[8,1], index: 5, kind: input, shape index: {}]   ;;  %s1553_s2 = inlined_call_operand.vmem [shape: f32[1,128], index: 2, kind: input, shape index: {}]   ;;  %s1554_s3 = inlined_call_operand.vmem [shape: f32[8,8], index: 3, kind: input, shape index: {}]   ;;  %s1555_s7 = inlined_call_operand.vmem [shape: f32[8,128], index: 7, kind: output, shape index: {1}]   ;;  %s1556_s6 = inlined_call_operand.vmem [shape: f32[8,8], index: 6, kind: output, shape index: {0}]  }
   0x1   :  { %v33_v0 = vld [vmem:[%s1549_s1] sm:$0xff]  ;;  %v34_v1 = vld [vmem:[%s1549_s1 + $0x8] sm:$0xff]  ;;  %v35_v2 = vld [vmem:[%s1549_s1 + $0x10] sm:$0xff]  ;;  %1177 = vmatprep.subr.mxu1 %v1274_v32  ;;  %1179 = vmatprep.mubr.msk.f32.mxu1 %vm1275_vm0, %v1274_v32  ;;  %vm225_vm2 = vcmask 1041409   ;;  %vm227_vm3 = vcmask 1042434   ;;  %vm229_vm4 = vcmask 1043459  }
   0x2   :  { %v1217_v3 = vpack.c.bf16 %v34_v1, %v33_v0  ;;  %v36_v4 = vld [vmem:[%s1549_s1 + $0x18] sm:$0xff]  ;;  %v37_v6 = vld [vmem:[%s1549_s1 + $0x20] sm:$0xff]  ;;  %v38_v7 = vld [vmem:[%s1549_s1 + $0x28] sm:$0xff]  ;;  %1253 = vset.pattern.permute.xlu0 %v1276_v33  ;;  %vm231_vm5 = vcmask 1044484   ;;  %vm233_vm6 = vcmask 1045509   ;;  %vm235_vm7 = vcmask 1046534  }
   0x3   :  { %v1221_v5 = vpack.c.bf16 %v36_v4, %v35_v2  ;;  %v1225_v8 = vpack.c.bf16 %v38_v7, %v37_v6  ;;  %v25_v9 = vld [vmem:[%s1550_s0] sm:$0xff]  ;;  %v39_v10 = vld [vmem:[%s1549_s1 + $0x30] sm:$0xff]  ;;  %v40_v11 = vld [vmem:[%s1549_s1 + $0x38] sm:$0xff]  ;;  %vm237_vm8 = vcmask 1047559  }
   0x4   :  { %1218 = vmatprep.subr.bf16.mxu0 %v1217_v3  ;;  %1165 = vmatprep.mubr.f32.mxu0 %v25_v9  ;;  %v1229_v12 = vpack.c.bf16 %v40_v11, %v39_v10  ;;  %v41_v13 = vld [vmem:[%s1549_s1 + $0x40] sm:$0xff]  ;;  %v42_v14 = vld [vmem:[%s1549_s1 + $0x48] sm:$0xff]  ;;  %v43_v16 = vld [vmem:[%s1549_s1 + $0x50] sm:$0xff] }
   0x5   :  { %1220 = vmatpush3.bf16.msra.mxu0 %v1217_v3  ;;  %v1233_v15 = vpack.c.bf16 %v42_v14, %v41_v13  ;;  %v44_v17 = vld [vmem:[%s1549_s1 + $0x58] sm:$0xff]  ;;  %v45_v19 = vld [vmem:[%s1549_s1 + $0x60] sm:$0xff]  ;;  %v46_v20 = vld [vmem:[%s1549_s1 + $0x68] sm:$0xff] }
   0x6   :  { %1222 = vmatprep.subr.bf16.mxu0 %v1221_v5  ;;  %v1237_v18 = vpack.c.bf16 %v44_v17, %v43_v16  ;;  %v1241_v21 = vpack.c.bf16 %v46_v20, %v45_v19  ;;  %v47_v22 = vld [vmem:[%s1549_s1 + $0x70] sm:$0xff]  ;;  %v48_v23 = vld [vmem:[%s1549_s1 + $0x78] sm:$0xff]  ;;  %v26_v25 = vld [vmem:[%s1550_s0 + $0x8] sm:$0xff] }
   0x7   :  { %v1245_v24 = vpack.c.bf16 %v48_v23, %v47_v22  ;;  %v27_v26 = vld [vmem:[%s1550_s0 + $0x10] sm:$0xff]  ;;  %v28_v27 = vld [vmem:[%s1550_s0 + $0x18] sm:$0xff]  ;;  %v29_v28 = vld [vmem:[%s1550_s0 + $0x20] sm:$0xff] }
   0x8   :  { %v30_v29 = vld [vmem:[%s1550_s0 + $0x28] sm:$0xff]  ;;  %v31_v30 = vld [vmem:[%s1550_s0 + $0x30] sm:$0xff]  ;;  %v32_v31 = vld [vmem:[%s1550_s0 + $0x38] sm:$0xff] }
   0x9   :  { %1224 = vmatpush3.bf16.msra.mxu0 %v1221_v5  ;;  %v242_v34 = vld [vmem:[%s1551_s4] sm:$0xff] }
   0xa   :  { %1226 = vmatprep.subr.bf16.mxu0 %v1225_v8  ;;  %245 = vperm.xlu0 %1253, %v242_v34   ;;  %v820_v35 = vld [vmem:[%s1552_s5] sm:$0xff] }
   0xb   :  { %v1084_v36 = vld [vmem:[%s1553_s2] ss:$0 sm:$0xff] }
   0xc   :  { %v1409_v44 = vld [vmem:[%s1554_s3] sm:$0xff] }
   0xd   :  { %1228 = vmatpush3.bf16.msra.mxu0 %v1225_v8 }
   0xe   :  { %1230 = vmatprep.subr.bf16.mxu0 %v1229_v12  ;;  %823 = vperm.xlu0 %1253, %v820_v35  }
  0x11   :  { %1232 = vmatpush3.bf16.msra.mxu0 %v1229_v12 }
  0x12   :  { %1234 = vmatprep.subr.bf16.mxu0 %v1233_v15 }
  0x15   :  { %1236 = vmatpush3.bf16.msra.mxu0 %v1233_v15 }
  0x16   :  { %1238 = vmatprep.subr.bf16.mxu0 %v1237_v18 }
  0x19   :  { %1240 = vmatpush3.bf16.msra.mxu0 %v1237_v18 }
  0x1a   :  { %1242 = vmatprep.subr.bf16.mxu0 %v1241_v21 }
  0x1d   :  { %1244 = vmatpush3.bf16.msra.mxu0 %v1241_v21 }
  0x1e   :  { %1246 = vmatprep.subr.bf16.mxu0 %v1245_v24 }
  0x21   :  { %1248 = vmatpush3.bf16.msra.mxu0 %v1245_v24 }
  0x24   :  { %1166 = vmatmul.mubr.f32.vlgmr.msra.gmra.mrb[0].mxu0 %v26_v25 }
  0x25   :  { %1168 = vmatprep.mubr.f32.mxu0 %v27_v26 }
  0x28   :  { %1169 = vmatmul.mubr.f32.gmra.mrb[2].mxu0 %v28_v27 }
  0x29   :  { %1171 = vmatprep.mubr.f32.mxu0 %v29_v28 }
  0x2c   :  { %1172 = vmatmul.mubr.f32.gmra.mrb[4].mxu0 %v30_v29 }
  0x2d   :  { %1174 = vmatprep.mubr.f32.mxu0 %v31_v30 }
  0x30   :  { %1175 = vmatmul.mubr.f32.gmra.mrb[6].mxu0 %v32_v31 }
  0xf7   :  { %v1167_v37 = vpop.f32.mrb[0].mxu0 }
  0xf8   :  { %v128_v38 = vadd.f32 %v1167_v37, %v1084_v36  ;;  %v122_v39 = vpop.f32.mrb[1].mxu0 }
  0xf9   :  { %v123_v40 = vadd.f32 %v1084_v36, %v122_v39 }
  0xfa   :  { %v1402_v41 = vmax.f32 %v128_v38, 0.0 }
  0xfb   :  { %v1404_v42 = vmax.f32 %v123_v40, 0.0  ;;  %v1170_v43 = vpop.f32.mrb[2].mxu0 }
  0xfc   :  { %v175_v45 = vrot.slane %v1402_v41, 4  ;;  %v138_v46 = vadd.f32 %v1170_v43, %v1084_v36  ;;  %v132_v47 = vpop.f32.mrb[3].mxu0 }
  0xfd   :  { %v169_v48 = vrot.slane %v1404_v42, 4  ;;  %v133_v49 = vadd.f32 %v1084_v36, %v132_v47  ;;  %1178 = vmatpush3.msra.mxu1 %v1404_v42 }
  0xfe   :  { %v176_v50 = vmax.f32 %v1402_v41, %v175_v45  ;;  %v1415_v51 = vmax.f32 %v138_v46, 0.0  ;;  %1180 = vmatmul.mubr.msk.f32.vlgmr.msra.gmra.mrb[0].mxu1 %vm248_vm1, %v1409_v44  ;;  %1182 = vmatprep.subr.mxu1 %v1274_v32 }
  0xff   :  { %v170_v52 = vmax.f32 %v1404_v42, %v169_v48  ;;  %v1421_v53 = vmax.f32 %v133_v49, 0.0  ;;  %v1173_v54 = vpop.f32.mrb[4].mxu0  ;;  %1183 = vmatpush3.msra.mxu1 %v1402_v41  ;;  %1184 = vmatprep.mubr.msk.f32.mxu1 %vm1275_vm0, %v1274_v32 }
 0x100   :  { %v177_v55 = vrot.slane %v176_v50, 2  ;;  %v187_v56 = vrot.slane %v1415_v51, 4  ;;  %v148_v57 = vadd.f32 %v1173_v54, %v1084_v36  ;;  %v142_v58 = vpop.f32.mrb[5].mxu0  ;;  %1187 = vmatprep.subr.mxu1 %v1274_v32 }
 0x101   :  { %v171_v59 = vrot.slane %v170_v52, 2  ;;  %v181_v60 = vrot.slane %v1421_v53, 4  ;;  %v143_v61 = vadd.f32 %v1084_v36, %v142_v58 }
 0x102   :  { %v178_v62 = vmax.f32 %v176_v50, %v177_v55  ;;  %v188_v63 = vmax.f32 %v1415_v51, %v187_v56  ;;  %v1430_v0 = vmax.f32 %v148_v57, 0.0  ;;  %1185 = vmatmul.mubr.msk.f32.vlgmr.msra.gmra.mrb[2].mxu1 %vm248_vm1, %v1409_v44 }
 0x103   :  { %v172_v1 = vmax.f32 %v170_v52, %v171_v59  ;;  %v182_v2 = vmax.f32 %v1421_v53, %v181_v60  ;;  %v1435_v3 = vmax.f32 %v143_v61, 0.0  ;;  %1188 = vmatpush3.msra.mxu1 %v1421_v53  ;;  %v1176_v4 = vpop.f32.mrb[6].mxu0  ;;  %1189 = vmatprep.mubr.msk.f32.mxu1 %vm1275_vm0, %v1274_v32  ;;  %v882_v59 = vlaneseq }
 0x104   :  { %v179_v5 = vrot.slane %v178_v62, 1  ;;  %v189_v6 = vrot.slane %v188_v63, 2  ;;  %v199_v7 = vrot.slane %v1430_v0, 4  ;;  %v158_v8 = vadd.f32 %v1176_v4, %v1084_v36  ;;  %v152_v9 = vpop.f32.mrb[7].mxu0  ;;  %1192 = vmatprep.subr.mxu1 %v1274_v32 }
 0x105   :  { %v173_v10 = vrot.slane %v172_v1, 1  ;;  %v183_v11 = vrot.slane %v182_v2, 2  ;;  %v193_v12 = vrot.slane %v1435_v3, 4  ;;  %v153_v13 = vadd.f32 %v1084_v36, %v152_v9 }
 0x106   :  { %v190_v14 = vmax.f32 %v188_v63, %v189_v6  ;;  %v200_v15 = vmax.f32 %v1430_v0, %v199_v7  ;;  %v1444_v16 = vmax.f32 %v158_v8, 0.0  ;;  %1190 = vmatmul.mubr.msk.f32.vlgmr.msra.gmra.mrb[4].mxu1 %vm248_vm1, %v1409_v44  ;;  %v180_v20 = vmax.f32 %v178_v62, %v179_v5  ;;  %v246_v63 = vpop.permute.xlu0 %245 }
 0x107   :  { %v184_v17 = vmax.f32 %v182_v2, %v183_v11  ;;  %v194_v18 = vmax.f32 %v1435_v3, %v193_v12  ;;  %v1449_v19 = vmax.f32 %v153_v13, 0.0  ;;  %1193 = vmatpush3.msra.mxu1 %v1415_v51  ;;  %1194 = vmatprep.mubr.msk.f32.mxu1 %vm1275_vm0, %v1274_v32  ;;  %v174_v21 = vmax.f32 %v172_v1, %v173_v10 }
 0x108   :  { %v201_v22 = vrot.slane %v200_v15, 2  ;;  %v211_v23 = vrot.slane %v1444_v16, 4  ;;  %1197 = vmatprep.subr.mxu1 %v1274_v32  ;;  %v191_v27 = vrot.slane %v190_v14, 1  ;;  %v1494_v60 = vand.u32 127, %v882_v59 }
 0x109   :  { %v185_v24 = vrot.slane %v184_v17, 1  ;;  %v195_v25 = vrot.slane %v194_v18, 2  ;;  %v205_v26 = vrot.slane %v1449_v19, 4  ;;  %v226_v36 = vsel %vm225_vm2, %v180_v20, %v174_v21 }
 0x10a   :  { %v202_v28 = vmax.f32 %v200_v15, %v201_v22  ;;  %v212_v29 = vmax.f32 %v1444_v16, %v211_v23  ;;  %1195 = vmatmul.mubr.msk.f32.vlgmr.msra.gmra.mrb[6].mxu1 %vm248_vm1, %v1409_v44  ;;  %v192_v40 = vmax.f32 %v190_v14, %v191_v27  ;;  %v1496_v61 = vshrl.u32 %v882_v59, 7  ;;  %v1502_v9 = vpop.permute.xlu0 %823 }
 0x10b   :  { %v186_v30 = vmax.f32 %v184_v17, %v185_v24  ;;  %v196_v31 = vmax.f32 %v194_v18, %v195_v25  ;;  %v206_v33 = vmax.f32 %v1449_v19, %v205_v26  ;;  %1198 = vmatpush3.msra.mxu1 %v1435_v3  ;;  %1199 = vmatprep.mubr.msk.f32.mxu1 %vm1275_vm0, %v1274_v32  ;;  %vm884_vm9 = vcmp.lt.s32.totalorder %v1494_v60, 12 }
 0x10c   :  { %v203_v34 = vrot.slane %v202_v28, 1  ;;  %v213_v35 = vrot.slane %v212_v29, 2  ;;  %1202 = vmatprep.subr.mxu1 %v1274_v32  ;;  %v1500_v62 = vsub.s32 %v1494_v60, %v1496_v61  ;;  %v965_v60 = vsub.s32 0, %v1496_v61 }
 0x10d   :  { %v197_v37 = vrot.slane %v196_v31, 1  ;;  %v207_v38 = vrot.slane %v206_v33, 2  ;;  %v228_v39 = vsel %vm227_vm3, %v186_v30, %v226_v36 }
 0x10e   :  { %v214_v43 = vmax.f32 %v212_v29, %v213_v35  ;;  %1200 = vmatmul.mubr.msk.f32.vlgmr.msra.gmra.mrb[8].mxu1 %vm248_vm1, %v1409_v44  ;;  %v204_v47 = vmax.f32 %v202_v28, %v203_v34  ;;  %v230_v49 = vsel %vm229_vm4, %v192_v40, %v228_v39 }
 0x10f   :  { %v198_v45 = vmax.f32 %v196_v31, %v197_v37  ;;  %v208_v46 = vmax.f32 %v206_v33, %v207_v38  ;;  %1203 = vmatpush3.msra.mxu1 %v1430_v0  ;;  %1204 = vmatprep.mubr.msk.f32.mxu1 %vm1275_vm0, %v1274_v32 }
 0x110   :  { %1207 = vmatprep.subr.mxu1 %v1274_v32  ;;  %v215_v48 = vrot.slane %v214_v43, 1 }
 0x111   :  { %v209_v50 = vrot.slane %v208_v46, 1  ;;  %v232_v52 = vsel %vm231_vm5, %v198_v45, %v230_v49 }
 0x112   :  { %1205 = vmatmul.mubr.msk.f32.vlgmr.msra.gmra.mrb[10].mxu1 %vm248_vm1, %v1409_v44  ;;  %v216_v54 = vmax.f32 %v214_v43, %v215_v48  ;;  %v234_v56 = vsel %vm233_vm6, %v204_v47, %v232_v52 }
 0x113   :  { %1208 = vmatpush3.msra.mxu1 %v1449_v19  ;;  %1209 = vmatprep.mubr.msk.f32.mxu1 %vm1275_vm0, %v1274_v32  ;;  %v210_v55 = vmax.f32 %v208_v46, %v209_v50 }
 0x114   :  { %1212 = vmatprep.subr.mxu1 %v1274_v32 }
 0x115   :  { %v236_v57 = vsel %vm235_vm7, %v210_v55, %v234_v56 }
 0x116   :  { %1210 = vmatmul.mubr.msk.f32.vlgmr.msra.gmra.mrb[12].mxu1 %vm248_vm1, %v1409_v44  ;;  %v238_v58 = vsel %vm237_vm8, %v216_v54, %v236_v57 }
 0x117   :  { %1213 = vmatpush3.msra.mxu1 %v1444_v16  ;;  %1214 = vmatprep.mubr.msk.f32.mxu1 %vm1275_vm0, %v1274_v32  ;;  %240 = vst [vmem:[%s1555_s7] sm:$0xff] %v238_v58 }
 0x11a   :  { %1215 = vmatmul.mubr.msk.f32.vlgmr.msra.gmra.mrb[14].mxu1 %vm248_vm1, %v1409_v44 }
 0x1d1   :  { %v318_v1 = vpop.f32.mrb[0].mxu1 }
 0x1d2   :  { %v319_v2 = vadd.f32 %v318_v1, %v246_v63  ;;  %v1181_v32 = vpop.f32.mrb[1].mxu1 }
 0x1d4   :  { %1254 = vtanh.f32 %v319_v2 }
 0x1d5   :  { %v388_v4 = vpop.f32.mrb[2].mxu1 }
 0x1d6   :  { %v389_v5 = vadd.f32 %v388_v4, %v246_v63  ;;  %v1186_v6 = vpop.f32.mrb[3].mxu1 }
 0x1d8   :  { %1256 = vtanh.f32 %v389_v5 }
 0x1d9   :  { %v458_v7 = vpop.f32.mrb[4].mxu1 }
 0x1da   :  { %v459_v44 = vadd.f32 %v458_v7, %v246_v63  ;;  %v1191_v8 = vpop.f32.mrb[5].mxu1 }
 0x1dc   :  { %1258 = vtanh.f32 %v459_v44 }
 0x1dd   :  { %v528_v10 = vpop.f32.mrb[6].mxu1 }
 0x1de   :  { %v1255_v11 = vpop.eup %1254  ;;  %v529_v12 = vadd.f32 %v528_v10, %v246_v63  ;;  %v1196_v13 = vpop.f32.mrb[7].mxu1 }
 0x1df   :  { %v826_v14 = vmul.f32 %v1255_v11, %v1502_v9 }
 0x1e0   :  { %1260 = vtanh.f32 %v529_v12 }
 0x1e1   :  { %v834_v15 = vrot.slane %v826_v14, 4  ;;  %v598_v17 = vpop.f32.mrb[8].mxu1 }
 0x1e2   :  { %v1257_v18 = vpop.eup %1256  ;;  %v599_v20 = vadd.f32 %v598_v17, %v246_v63  ;;  %v1201_v21 = vpop.f32.mrb[9].mxu1 }
 0x1e3   :  { %v827_v22 = vmul.f32 %v1257_v18, %v1502_v9  ;;  %v835_v23 = vadd.f32 %v834_v15, %v826_v14 }
 0x1e4   :  { %1262 = vtanh.f32 %v599_v20 }
 0x1e5   :  { %v840_v24 = vrot.slane %v827_v22, 4  ;;  %v668_v25 = vpop.f32.mrb[10].mxu1  ;;  %v836_v26 = vrot.slane %v835_v23, 2 }
 0x1e6   :  { %v1259_v27 = vpop.eup %1258  ;;  %v669_v28 = vadd.f32 %v668_v25, %v246_v63  ;;  %v1206_v29 = vpop.f32.mrb[11].mxu1 }
 0x1e7   :  { %v828_v30 = vmul.f32 %v1259_v27, %v1502_v9  ;;  %v841_v31 = vadd.f32 %v840_v24, %v827_v22  ;;  %v837_v33 = vadd.f32 %v836_v26, %v835_v23 }
 0x1e8   :  { %1264 = vtanh.f32 %v669_v28 }
 0x1e9   :  { %v846_v34 = vrot.slane %v828_v30, 4  ;;  %v738_v35 = vpop.f32.mrb[12].mxu1  ;;  %v842_v36 = vrot.slane %v841_v31, 2  ;;  %v838_v40 = vrot.slane %v837_v33, 1 }
 0x1ea   :  { %v1261_v37 = vpop.eup %1260  ;;  %v739_v38 = vadd.f32 %v738_v35, %v246_v63  ;;  %v1211_v39 = vpop.f32.mrb[13].mxu1 }
 0x1eb   :  { %v829_v43 = vmul.f32 %v1261_v37, %v1502_v9  ;;  %v843_v45 = vadd.f32 %v842_v36, %v841_v31  ;;  %v847_v46 = vadd.f32 %v846_v34, %v828_v30  ;;  %v839_v56 = vadd.f32 %v838_v40, %v837_v33 }
 0x1ec   :  { %1266 = vtanh.f32 %v739_v38 }
 0x1ed   :  { %v808_v47 = vpop.f32.mrb[14].mxu1  ;;  %v844_v48 = vrot.slane %v843_v45, 1  ;;  %v848_v49 = vrot.slane %v847_v46, 2  ;;  %v852_v50 = vrot.slane %v829_v43, 4 }
 0x1ee   :  { %v1263_v52 = vpop.eup %1262  ;;  %v809_v54 = vadd.f32 %v808_v47, %v246_v63  ;;  %v1216_v55 = vpop.f32.mrb[15].mxu1 }
 0x1ef   :  { %v830_v57 = vmul.f32 %v1263_v52, %v1502_v9  ;;  %v845_v58 = vadd.f32 %v844_v48, %v843_v45  ;;  %v849_v59 = vadd.f32 %v848_v49, %v847_v46  ;;  %v853_v1 = vadd.f32 %v852_v50, %v829_v43 }
 0x1f0   :  { %1268 = vtanh.f32 %v809_v54 }
 0x1f1   :  { %v858_v2 = vrot.slane %v830_v57, 4  ;;  %v850_v32 = vrot.slane %v849_v59, 1  ;;  %v854_v4 = vrot.slane %v853_v1, 2  ;;  %v895_v5 = vsel %vm225_vm2, %v845_v58, %v839_v56 }
 0x1f2   :  { %v1265_v6 = vpop.eup %1264 }
 0x1f3   :  { %v859_v7 = vadd.f32 %v858_v2, %v830_v57  ;;  %v831_v44 = vmul.f32 %v1265_v6, %v1502_v9  ;;  %v851_v8 = vadd.f32 %v850_v32, %v849_v59  ;;  %v855_v10 = vadd.f32 %v854_v4, %v853_v1 }
 0x1f4   :  { %v1277_v57 = vmov 1966171168  }
 0x1f5   :  { %v860_v63 = vrot.slane %v859_v7, 2  ;;  %v864_v11 = vrot.slane %v831_v44, 4  ;;  %v856_v12 = vrot.slane %v855_v10, 1  ;;  %v896_v13 = vsel %vm227_vm3, %v851_v8, %v895_v5 }
 0x1f6   :  { %v1267_v14 = vpop.eup %1266  ;;  %v916_v58 = vunpack.c.l.s4 %v1277_v57 }
 0x1f7   :  { %v865_v15 = vadd.f32 %v864_v11, %v831_v44  ;;  %v832_v17 = vmul.f32 %v1267_v14, %v1502_v9  ;;  %v857_v18 = vadd.f32 %v856_v12, %v855_v10  ;;  %v861_v20 = vadd.f32 %v860_v63, %v859_v7 }
 0x1f8   :  { %v917_v59 = vunpack.c.0.s8 %v916_v58 }
 0x1f9   :  { %v870_v21 = vrot.slane %v832_v17, 4  ;;  %v862_v22 = vrot.slane %v861_v20, 1  ;;  %v866_v23 = vrot.slane %v865_v15, 2  ;;  %v897_v24 = vsel %vm229_vm4, %v857_v18, %v896_v13 }
 0x1fa   :  { %v1269_v25 = vpop.eup %1268  ;;  %v920_v1 = vsub.s32 %v917_v59, %v1496_v61 }
 0x1fb   :  { %v833_v26 = vmul.f32 %v1269_v25, %v1502_v9  ;;  %v863_v27 = vadd.f32 %v862_v22, %v861_v20  ;;  %v867_v28 = vadd.f32 %v866_v23, %v865_v15  ;;  %v871_v29 = vadd.f32 %v870_v21, %v832_v17 }
 0x1fd   :  { %v868_v30 = vrot.slane %v867_v28, 1  ;;  %v872_v31 = vrot.slane %v871_v29, 2  ;;  %v876_v33 = vrot.slane %v833_v26, 4  ;;  %v898_v34 = vsel %vm231_vm5, %v863_v27, %v897_v24 }
 0x1ff   :  { %v869_v35 = vadd.f32 %v868_v30, %v867_v28  ;;  %v873_v36 = vadd.f32 %v872_v31, %v871_v29  ;;  %v877_v37 = vadd.f32 %v876_v33, %v833_v26 }
 0x201   :  { %v874_v38 = vrot.slane %v873_v36, 1  ;;  %v878_v39 = vrot.slane %v877_v37, 2  ;;  %v899_v40 = vsel %vm233_vm6, %v869_v35, %v898_v34 }
 0x203   :  { %v875_v43 = vadd.f32 %v874_v38, %v873_v36  ;;  %v879_v45 = vadd.f32 %v878_v39, %v877_v37 }
 0x205   :  { %v880_v46 = vrot.slane %v879_v45, 1  ;;  %v900_v9 = vsel %vm235_vm7, %v875_v43, %v899_v40 }
 0x207   :  { %v881_v47 = vadd.f32 %v880_v46, %v879_v45 }
 0x209   :  { %v901_v48 = vsel %vm237_vm8, %v881_v47, %v900_v9 }
 0x20a   :  { %v903_v49 = vsel %vm884_vm9, %v901_v48, -1e+30 }
 0x20b   :  { %904 = vmax.xlane.f32.xlu1 %v903_v49 }
 0x298   :  { %v905_v50 = vpop.xlane.xlu1 %904 }
 0x299   :  { %v906_v52 = vsub.f32 %v903_v49, %v905_v50 }
 0x29b   :  { %v907_v54 = vmul.f32 1.442695, %v906_v52 }
 0x29d   :  { %1270 = vpow2.f32 %v907_v54 }
 0x2a7   :  { %v1271_v55 = vpop.eup %1270 }
 0x2a8   :  { %909 = vadd.xlane.f32.xlu1 %v1271_v55 }
 0x335   :  { %v910_v56 = vpop.xlane.xlu1 %909 }
 0x336   :  { %1272 = vrcp.f32 %v910_v56 }
 0x340   :  { %v1273_v2 = vpop.eup %1272 }
 0x341   :  { %v912_v32 = vmul.f32 %v1273_v2, %v1271_v55 }
 0x343   :  { %v921_v4 = vrot.slane %v912_v32, %v920_v1  ;;  %v914_v5 = vcombine.high %v912_v32, %v912_v32 }
 0x345   :  { %v937_v6 = vrot.slane %v921_v4, %v920_v1  ;;  %v929_v7 = vcombine.high %v921_v4, %v921_v4  ;;  %v928_v63 = vrot.slane %v914_v5, %v920_v1 }
 0x347   :  { %v966_v44 = vrot.slane %v937_v6, %v965_v60  ;;  %v951_v8 = vrot.slane %v929_v7, %v920_v1  ;;  %v959_v10 = vcombine.high %v937_v6, %v937_v6  ;;  %v944_v15 = vrot.slane %v928_v63, %v920_v1 }
 0x348   :  { %v930_v20 = vcombine.high %v928_v63, %v928_v63 }
 0x349   :  { %v1003_v11 = vmul.f32 %v966_v44, %v1404_v42  ;;  %v970_v12 = vrot.slane %v951_v8, %v965_v60  ;;  %v974_v14 = vrot.slane %v959_v10, %v965_v60  ;;  %v982_v61 = vrot.slane %v944_v15, %v965_v60 }
 0x34a   :  { %v961_v18 = vcombine.high %v951_v8, %v951_v8  ;;  %v958_v23 = vrot.slane %v930_v20, %v920_v1  ;;  %v960_v25 = vcombine.high %v944_v15, %v944_v15 }
 0x34b   :  { %1011 = vadd.xlane.f32.xlu0 %v1003_v11  ;;  %v1004_v13 = vmul.f32 %v970_v12, %v1402_v41  ;;  %v1005_v17 = vmul.f32 %v974_v14, %v1421_v53  ;;  %v1007_v21 = vmul.f32 %v982_v61, %v1435_v3 }
 0x34c   :  { %v978_v22 = vrot.slane %v961_v18, %v965_v60  ;;  %v986_v24 = vrot.slane %v958_v23, %v965_v60  ;;  %v990_v26 = vrot.slane %v960_v25, %v965_v60  ;;  %v962_v27 = vcombine.high %v958_v23, %v958_v23 }
 0x34d   :  { %1013 = vadd.xlane.f32.xlu1 %v1004_v13 }
 0x34e   :  { %v1006_v42 = vmul.f32 %v978_v22, %v1415_v51  ;;  %v1008_v41 = vmul.f32 %v986_v24, %v1430_v0  ;;  %v1009_v53 = vmul.f32 %v990_v26, %v1449_v19  ;;  %v994_v28 = vrot.slane %v962_v27, %v965_v60 }
 0x350   :  { %v1010_v29 = vmul.f32 %v994_v28, %v1444_v16 }
 0x351   :  { %1015 = vadd.xlane.f32.xlu1 %v1005_v17 }
 0x355   :  { %1019 = vadd.xlane.f32.xlu1 %v1007_v21 }
 0x359   :  { %1017 = vadd.xlane.f32.xlu1 %v1006_v42 }
 0x35d   :  { %1021 = vadd.xlane.f32.xlu1 %v1008_v41 }
 0x361   :  { %1023 = vadd.xlane.f32.xlu1 %v1009_v53 }
 0x365   :  { %1025 = vadd.xlane.f32.xlu1 %v1010_v29 }
 0x3d8   :  { %v1012_v51 = vpop.xlane.xlu0 %1011 }
 0x3d9   :  { %v1038_v36 = vrot.slane %v1012_v51, %v1500_v62 }
 0x3da   :  { %v1014_v3 = vpop.xlane.xlu1 %1013 }
 0x3db   :  { %v1042_v34 = vrot.slane %v1014_v3, %v1500_v62 }
 0x3dd   :  { %v1067_v19 = vsel %vm225_vm2, %v1042_v34, %v1038_v36 }
 0x3de   :  { %v1016_v30 = vpop.xlane.xlu1 %1015 }
 0x3df   :  { %v1046_v35 = vrot.slane %v1016_v30, %v1500_v62 }
 0x3e1   :  { %v1068_v38 = vsel %vm227_vm3, %v1046_v35, %v1067_v19 }
 0x3e2   :  { %v1020_v31 = vpop.xlane.xlu1 %1019 }
 0x3e3   :  { %v1054_v43 = vrot.slane %v1020_v31, %v1500_v62 }
 0x3e6   :  { %v1018_v33 = vpop.xlane.xlu1 %1017 }
 0x3e7   :  { %v1050_v37 = vrot.slane %v1018_v33, %v1500_v62 }
 0x3e9   :  { %v1069_v39 = vsel %vm229_vm4, %v1050_v37, %v1068_v38 }
 0x3ea   :  { %v1022_v0 = vpop.xlane.xlu1 %1021  ;;  %v1070_v46 = vsel %vm231_vm5, %v1054_v43, %v1069_v39 }
 0x3eb   :  { %v1058_v40 = vrot.slane %v1022_v0, %v1500_v62 }
 0x3ed   :  { %v1071_v47 = vsel %vm233_vm6, %v1058_v40, %v1070_v46 }
 0x3ee   :  { %v1024_v16 = vpop.xlane.xlu1 %1023 }
 0x3ef   :  { %v1062_v45 = vrot.slane %v1024_v16, %v1500_v62 }
 0x3f1   :  { %v1072_v49 = vsel %vm235_vm7, %v1062_v45, %v1071_v47 }
 0x3f2   :  { %v1026_v9 = vpop.xlane.xlu1 %1025 }
 0x3f3   :  { %v1066_v48 = vrot.slane %v1026_v9, %v1500_v62 }
 0x3f5   :  { %v1073_v50 = vsel %vm237_vm8, %v1066_v48, %v1072_v49 }
 0x3f6   :  { %1075 = vst.msk [vmem:[%s1556_s6] sm:$0xff] %vm248_vm1, %v1073_v50 }

</bundles_post_ra>
